<compile_context>
chip_gen: v5e
topology: v5e:2x2
jax: 0.10.0
libtpu: 0.0.40
codegen_flags: <defaults>
</compile_context>

<pallas_src>
import jax
import jax.numpy as jnp
from jax.experimental import pallas as pl
from jax.experimental.pallas import tpu as pltpu

_LANE = 128
_SUB = 8


def _round_up(x, m):
    return ((x + m - 1) // m) * m


def _graph_output_kernel(x_ref, w_ref, out_ref):
    # x_ref:  (Tb, Tn, D+1)  atoms pre-masked, mask appended as last feature
    # w_ref:  (D+1, F)       weight with bias stacked as the last row
    # out_ref:(Tb, F)        resident accumulator across the atom-tile axis
    j = pl.program_id(1)

    @pl.when(j == 0)
    def _init():
        out_ref[...] = jnp.zeros_like(out_ref)

    tb, tn, d = x_ref.shape
    # Fold all molecules of this tile into one large MXU matmul.
    x = x_ref[...].reshape(tb * tn, d)                              # (Tb*Tn, D+1)
    fp = jnp.tanh(
        jnp.dot(x, w_ref[...], preferred_element_type=jnp.float32)
    )                                                               # (Tb*Tn, F)
    # Per-molecule reduction over the atoms of this tile (mask/bias already in).
    out_ref[...] += jnp.sum(fp.reshape(tb, tn, -1), axis=1)         # (Tb, F)


def graph_output_p(atoms, edges, weight_t, bias, *,
                   tb_max=64, tn_max=1024,
                   vmem_budget_bytes=40 * 1024 * 1024,
                   matmul_dtype=jnp.float32):
    """atoms: [B, N, D] f32, edges: [B, N, E] i32,
    weight_t: [D, F] f32 (Linear weight pre-transposed), bias: [F] f32
    -> [B, F] f32."""
    B, N, D = atoms.shape
    F = weight_t.shape[1]
    d_aug = D + 1

    # Per-atom connectivity mask (== (edges != -1).sum(-1) != 0).  Computed once
    # in the wrapper; edges never hit the kernel's DMA path.
    mask = jnp.any(edges != -1, axis=-1, keepdims=True).astype(jnp.float32)

    # Fold mask into atoms and bias into weights:
    #   tanh([m*x, m] @ [[W],[b]]) = tanh(m*(x@W + b)) -> 0 if m==0 else tanh(x@W+b)
    atoms_aug = jnp.concatenate(
        [atoms.astype(jnp.float32) * mask, mask], axis=-1)          # [B, N, D+1]
    w_aug = jnp.concatenate(
        [weight_t.astype(jnp.float32),
         bias.astype(jnp.float32).reshape(1, F)], axis=0)           # [D+1, F]

    f_pad = _round_up(F, _LANE)                                     # lane-dense out
    d_lanes = _round_up(d_aug, _LANE)                               # VMEM lane pad

    # ---- tile selection against PADDED VMEM footprints -----------------------
    tn = min(_round_up(N, _SUB), _round_up(tn_max, _SUB))
    tb = min(_round_up(B, _SUB), _round_up(tb_max, _SUB))

    def footprint(tb_, tn_):
        atoms_b = 2 * tb_ * tn_ * d_lanes * 4                       # double-buffered
        w_b = _round_up(d_aug, _SUB) * f_pad * 4                    # grid-constant
        out_b = 2 * tb_ * f_pad * 4
        return atoms_b + w_b + out_b

    while footprint(tb, tn) > vmem_budget_bytes and tn > _SUB:
        tn = max(_SUB, _round_up(tn // 2, _SUB))
    while footprint(tb, tn) > vmem_budget_bytes and tb > _SUB:
        tb = max(_SUB, _round_up(tb // 2, _SUB))

    # v7x megacore: make sure the "parallel" batch axis has >= 2 tiles when the
    # batch is big enough, so both TensorCores get work.
    b_pad8 = _round_up(B, _SUB)
    if b_pad8 >= 2 * _SUB and b_pad8 // tb < 2:
        tb = max(_SUB, _round_up(b_pad8 // 2, _SUB))

    b_pad = _round_up(B, tb)
    n_pad = _round_up(N, tn)

    atoms_p = jnp.pad(atoms_aug, ((0, b_pad - B), (0, n_pad - N), (0, 0)))
    w_p = jnp.pad(w_aug, ((0, 0), (0, f_pad - F)))
    atoms_p = atoms_p.astype(matmul_dtype)
    w_p = w_p.astype(matmul_dtype)

    grid = (b_pad // tb, n_pad // tn)
    vmem_limit = int(min(56 * 1024 * 1024,
                         max(32 * 1024 * 1024, footprint(tb, tn) + (8 << 20))))

    out = pl.pallas_call(
        _graph_output_kernel,
        out_shape=jax.ShapeDtypeStruct((b_pad, f_pad), jnp.float32),
        grid_spec=pltpu.PrefetchScalarGridSpec(
            num_scalar_prefetch=0,
            grid=grid,
            in_specs=[
                pl.BlockSpec((tb, tn, d_aug), lambda i, j: (i, j, 0)),
                # Weight block is constant across the grid (fetched once per tile
                # schedule; tiny at typical fp_len).
                pl.BlockSpec((d_aug, f_pad), lambda i, j: (0, 0)),
            ],
            out_specs=pl.BlockSpec((tb, f_pad), lambda i, j: (i, 0)),
        ),
        compiler_params=pltpu.CompilerParams(
            dimension_semantics=("parallel", "arbitrary"),
            vmem_limit_bytes=vmem_limit,
        ),
    )(atoms_p, w_p)

    return out[:B, :F]


def _reference(atoms, edges, weight_t, bias):
    deg = jnp.sum((edges != -1).astype(jnp.int32), axis=-1, keepdims=True)
    mask = (deg != 0).astype(jnp.float32)
    fp = jnp.tanh(atoms @ weight_t + bias) * mask
    return jnp.sum(fp, axis=-2)


if __name__ == "__main__":
    key = jax.random.PRNGKey(0)

    # --- test 1: small shapes matching the module's forward ------------------
    B, N, E = 2, 8, 4          # batch, atoms per molecule, max degree
    D, F = 32, 128             # input_dim, output_dim (fp_len)
    k_atoms, k_edges, k_w, k_b, key = jax.random.split(key, 5)

    atoms = jax.random.normal(k_atoms, (B, N, D), dtype=jnp.float32)
    edges = jax.random.randint(k_edges, (B, N, E), -1, N, dtype=jnp.int32)
    edges = edges.at[0, 3, :].set(-1)          # a fully disconnected atom

    weight_t = (jax.random.normal(k_w, (D, F), dtype=jnp.float32)
                / jnp.sqrt(jnp.float32(D)))
    bias = jax.random.normal(k_b, (F,), dtype=jnp.float32) * 0.1

    out = jax.block_until_ready(graph_output_p(atoms, edges, weight_t, bias))
    ref = _reference(atoms, edges, weight_t, bias)
    assert out.shape == (B, F)
    assert jnp.allclose(out, ref, atol=1e-4, rtol=1e-5)

    # --- test 2: exercise batch/atom/feature padding + multi-tile reduction --
    B2, N2, E2, D2, F2 = 10, 20, 5, 32, 96
    k_atoms, k_edges, k_w, k_b, key = jax.random.split(key, 5)
    atoms2 = jax.random.normal(k_atoms, (B2, N2, D2), dtype=jnp.float32)
    edges2 = jax.random.randint(k_edges, (B2, N2, E2), -1, N2, dtype=jnp.int32)
    edges2 = edges2.at[1, 0, :].set(-1)
    weight_t2 = (jax.random.normal(k_w, (D2, F2), dtype=jnp.float32)
                 / jnp.sqrt(jnp.float32(D2)))
    bias2 = jax.random.normal(k_b, (F2,), dtype=jnp.float32) * 0.1

    out2 = jax.block_until_ready(
        graph_output_p(atoms2, edges2, weight_t2, bias2, tb_max=8, tn_max=8))
    ref2 = _reference(atoms2, edges2, weight_t2, bias2)
    assert out2.shape == (B2, F2)
    assert jnp.allclose(out2, ref2, atol=1e-4, rtol=1e-5)

    print("KERNEL_OK")
</pallas_src>

<mosaic_0001>
module attributes {stable_mosaic.version = 11 : i64} {
  func.func @_graph_output_kernel(%arg0: i32, %arg1: i32, %arg2: memref<8x8x33xf32, #tpu.memory_space<vmem>>, %arg3: memref<33x128xf32, #tpu.memory_space<vmem>>, %arg4: memref<8x128xf32, #tpu.memory_space<vmem>>) attributes {dimension_semantics = [#tpu.dimension_semantics<parallel>, #tpu.dimension_semantics<arbitrary>], iteration_bounds = array<i64: 1, 1>, scalar_prefetch = 0 : i64, scratch_operands = 0 : i64, tpu.core_type = #tpu.core_type<tc>, window_params = [{transform_indices = @transform_0, window_bounds = array<i64: 8, 8, 33>}, {pipeline_mode = #tpu.pipeline_mode<synchronous>, transform_indices = @transform_1, window_bounds = array<i64: 33, 128>}, {transform_indices = @transform_2, window_bounds = array<i64: 8, 128>}]} {
    %c0_i32 = arith.constant 0 : i32
    %0 = arith.cmpi eq, %arg1, %c0_i32 : i32
    %1 = arith.extui %0 : i1 to i32
    %c0_i32_0 = arith.constant 0 : i32
    %2 = arith.cmpi ne, %1, %c0_i32_0 : i32
    scf.if %2 {
      %cst_10 = arith.constant 0.000000e+00 : f32
      %13 = vector.broadcast %cst_10 : f32 to vector<8x128xf32>
      %c0_11 = arith.constant 0 : index
      %c0_12 = arith.constant 0 : index
      %14 = vector.load %arg4[%c0_11, %c0_12] : memref<8x128xf32, #tpu.memory_space<vmem>>, vector<8x128xf32>
      tpu.vector_store %arg4[%c0_11, %c0_12], %13 {strides = array<i32>} : memref<8x128xf32, #tpu.memory_space<vmem>>, vector<8x128xf32>,
    } else {
    }
    %c0 = arith.constant 0 : index
    %c0_1 = arith.constant 0 : index
    %c0_2 = arith.constant 0 : index
    %3 = vector.load %arg2[%c0, %c0_1, %c0_2] : memref<8x8x33xf32, #tpu.memory_space<vmem>>, vector<8x8x33xf32>
    %4 = vector.shape_cast %3 : vector<8x8x33xf32> to vector<64x33xf32>
    %c0_3 = arith.constant 0 : index
    %c0_4 = arith.constant 0 : index
    %5 = vector.load %arg3[%c0_3, %c0_4] : memref<33x128xf32, #tpu.memory_space<vmem>>, vector<33x128xf32>
    %cst = arith.constant dense<0.000000e+00> : vector<64x128xf32>
    %6 = tpu.matmul %4, %5, %cst {dimension_numbers = #tpu.dot_dimension_numbers<[1], [0], [0], [1], [0, 0, 1, 1], [], []>} : vector<64x33xf32>, vector<33x128xf32>, vector<64x128xf32> -> vector<64x128xf32>
    %7 = math.tanh %6 : vector<64x128xf32>
    %c0_5 = arith.constant 0 : index
    %c0_6 = arith.constant 0 : index
    %8 = vector.load %arg4[%c0_5, %c0_6] : memref<8x128xf32, #tpu.memory_space<vmem>>, vector<8x128xf32>
    %9 = vector.shape_cast %7 : vector<64x128xf32> to vector<8x8x128xf32>
    %cst_7 = arith.constant dense<0.000000e+00> : vector<8x128xf32>
    %10 = vector.multi_reduction <add>, %9, %cst_7 [1] : vector<8x8x128xf32> to vector<8x128xf32>
    %11 = arith.addf %8, %10 : vector<8x128xf32>
    %c0_8 = arith.constant 0 : index
    %c0_9 = arith.constant 0 : index
    %12 = vector.load %arg4[%c0_8, %c0_9] : memref<8x128xf32, #tpu.memory_space<vmem>>, vector<8x128xf32>
    tpu.vector_store %arg4[%c0_8, %c0_9], %11 {strides = array<i32>} : memref<8x128xf32, #tpu.memory_space<vmem>>, vector<8x128xf32>,
    return
  }
  func.func @transform_0(%arg0: i32, %arg1: i32) -> (i32, i32, i32) {
    %c0_i32 = arith.constant 0 : i32
    %c0_i32_0 = arith.constant 0 : i32
    return %arg0, %arg1, %c0_i32 : i32, i32, i32
  }
  func.func @transform_1(%arg0: i32, %arg1: i32) -> (i32, i32) {
    %c0_i32 = arith.constant 0 : i32
    %c0_i32_0 = arith.constant 0 : i32
    %c0_i32_1 = arith.constant 0 : i32
    return %c0_i32, %c0_i32_0 : i32, i32
  }
  func.func @transform_2(%arg0: i32, %arg1: i32) -> (i32, i32) {
    %c0_i32 = arith.constant 0 : i32
    %c0_i32_0 = arith.constant 0 : i32
    return %arg0, %c0_i32 : i32, i32
  }
}

</mosaic_0001>

<bundles_post_ra>
// kernel: tpu_custom_call.1
= control target key start
LH: loop header
LB: loop body
LE: loop exit
PB: predicated region body
PF: predicated region fallthrough
CT: control target
= control target key end

     0   :  { %7 = vsyncpa [#allocation3], 0  ;;  %s393_s0 = inlined_call_operand.hbm [shape: f32[8,8,33], index: 0, kind: input, shape index: {}]   ;;  %s394_s1 = inlined_call_operand.hbm [shape: f32[33,128], index: 1, kind: input, shape index: {}]   ;;  %s395_s2 = inlined_call_operand.hbm [shape: f32[8,128], index: 2, kind: output, shape index: {}]  }
   0x1   :  { %8 = vsyncpa [#allocation6], 0 }
   0x2   :  { %9 = vsyncpa [#allocation4], 0  ;;  %s14_s11 = sshll.u32 %s393_s0, 4  ;;  %s356_s12 = smov [#allocation2]   ;;  %s15_s11 = int_to_ptr.hbm [resolvable:$true] %s14_s11 }
   0x3   :  { %s16_s13 = sshll.u32 %s356_s12, 4  ;;  %s27_s16 = sshll.u32 %s394_s1, 4  ;;  %s17_s13 = int_to_ptr.vmem [resolvable:$true] %s16_s13  ;;  %s28_s16 = int_to_ptr.hbm [resolvable:$true] %s27_s16 }
   0x4   :  { %s357_s17 = smov 128   ;;  %s358_s18 = smov 8  }
   0x5   :  { %22 = dma.hbm_to_vmem [thread:$0]  %s15_s11, 1024, %s17_s13, [#allocation3], %s357_s17, %s357_s17, %s358_s18  }
   0x6   :  { %s359_s19 = smov [#allocation5]  }
   0x7   :  { %s29_s20 = sshll.u32 %s359_s19, 4  ;;  %s30_s20 = int_to_ptr.vmem [resolvable:$true] %s29_s20 }
   0x8   :  { %35 = dma.hbm_to_vmem [thread:$0]  %s28_s16, 640, %s30_s20, [#allocation6], %s357_s17, %s357_s17, %s358_s18  }
   0x9   :  { %350 = dma.done.wait [#allocation3], 1024  }
   0xa   :  { %351 = vsyncadd [#allocation3], 4294966272 }
   0xb   :  { %352 = dma.done.wait [#allocation6], 640  }
   0xc   :  { %353 = vsyncadd [#allocation6], 4294966656  ;;  %vm87_vm0 = vcmask 1040384   ;;  %v61_v0 = vld [vmem:[#allocation5 + $0x20] sm:$0x1]  ;;  %v60_v1 = vld [vmem:[#allocation5 + $0x18] sm:$0xff] }
   0xd   :  { %232 = vmatpush.msk.msra.mxu0 %vm87_vm0, %v61_v0  ;;  %241 = vmatpush.msk.msra.mxu1 %vm87_vm0, %v61_v0  ;;  %v59_v2 = vld [vmem:[#allocation5 + $0x10] sm:$0xff]  ;;  %v58_v3 = vld [vmem:[#allocation5 + $0x8] sm:$0xff]  ;;  %v57_v4 = vld [vmem:[#allocation5] sm:$0xff]  ;;  %vm62_vm1 = vcmask 269312   ;;  %vm197_vm2 = vcmask 1041409   ;;  %vm199_vm3 = vcmask 1042434  }
   0xe   :  { %242 = vmatpush.msk.msra.mxu2 %vm87_vm0, %v61_v0  ;;  %243 = vmatpush.msk.msra.mxu3 %vm87_vm0, %v61_v0  ;;  %v49_v5 = vld [vmem:[#allocation2] sm:$0xff]  ;;  %v51_v6 = vld [vmem:[#allocation2 + $0x10] sm:$0xff]  ;;  %v50_v9 = vld [vmem:[#allocation2 + $0x8] sm:$0xff]  ;;  %vm201_vm4 = vcmask 1043459   ;;  %vm203_vm5 = vcmask 1044484   ;;  %vm205_vm6 = vcmask 1045509  }
   0xf   :  { %103 = vmatpush.msra.mxu0 %v60_v1  ;;  %244 = vmatpush.msra.mxu1 %v60_v1  ;;  %v53_v7 = vld [vmem:[#allocation2 + $0x20] sm:$0xff]  ;;  %v55_v8 = vld [vmem:[#allocation2 + $0x30] sm:$0xff]  ;;  %v52_v10 = vld [vmem:[#allocation2 + $0x18] sm:$0xff]  ;;  %vm207_vm7 = vcmask 1046534   ;;  %vm209_vm8 = vcmask 1047559   ;;  %s360_s0 = smov [#allocation7]  }
  0x10   :  { %245 = vmatpush.msra.mxu2 %v60_v1  ;;  %246 = vmatpush.msra.mxu3 %v60_v1  ;;  %v54_v11 = vld [vmem:[#allocation2 + $0x28] sm:$0xff]  ;;  %v56_v12 = vld [vmem:[#allocation2 + $0x38] sm:$0xff]  ;;  %s219_s1 = sshll.u32 %s360_s0, 4  ;;  %s221_s23 = sshll.u32 %s395_s2, 4  ;;  %s220_s1 = int_to_ptr.vmem [resolvable:$true] %s219_s1  ;;  %s222_s23 = int_to_ptr.hbm [resolvable:$true] %s221_s23 }
  0x11   :  { %104 = vmatpush.msra.mxu0 %v59_v2  ;;  %247 = vmatpush.msra.mxu1 %v59_v2 }
  0x12   :  { %248 = vmatpush.msra.mxu2 %v59_v2  ;;  %249 = vmatpush.msra.mxu3 %v59_v2 }
  0x13   :  { %105 = vmatpush.msra.mxu0 %v58_v3  ;;  %250 = vmatpush.msra.mxu1 %v58_v3 }
  0x14   :  { %251 = vmatpush.msra.mxu2 %v58_v3  ;;  %252 = vmatpush.msra.mxu3 %v58_v3 }
  0x15   :  { %106 = vmatpush.msra.mxu0 %v57_v4  ;;  %253 = vmatpush.msra.mxu1 %v57_v4 }
  0x16   :  { %254 = vmatpush.msra.mxu2 %v57_v4  ;;  %255 = vmatpush.msra.mxu3 %v57_v4 }
  0x17   :  { %233 = vmatmul.msk.f32.vlgmr.msra.gmra.mxu0 %vm62_vm1, %v49_v5  ;;  %235 = vmatmul.msk.f32.vlgmr.msra.gmra.mxu1 %vm62_vm1, %v51_v6 }
  0x18   :  { %237 = vmatmul.msk.f32.vlgmr.msra.gmra.mxu2 %vm62_vm1, %v53_v7  ;;  %239 = vmatmul.msk.f32.vlgmr.msra.gmra.mxu3 %vm62_vm1, %v55_v8 }
  0x1f   :  { %234 = vmatmul.msk.f32.gmra.mxu0 %vm62_vm1, %v50_v9  ;;  %236 = vmatmul.msk.f32.gmra.mxu1 %vm62_vm1, %v52_v10 }
  0x20   :  { %238 = vmatmul.msk.f32.gmra.mxu2 %vm62_vm1, %v54_v11  ;;  %240 = vmatmul.msk.f32.gmra.mxu3 %vm62_vm1, %v56_v12 }
  0x94   :  { %v108_v13 = vpop.f32.mrf.mxu0  ;;  %v114_v14 = vpop.f32.mrf.mxu1 }
  0x95   :  { %262 = vtanh.f32 %v108_v13 }
  0x96   :  { %264 = vtanh.f32 %v114_v14 }
  0x9b   :  { %v263_v15 = vpop.eup %262  ;;  %v120_v16 = vpop.f32.mrf.mxu2 }
  0x9c   :  { %v126_v17 = vpop.f32.mrf.mxu3  ;;  %v265_v18 = vpop.eup %264  ;;  %v141_v19 = vrot.slane %v263_v15, 4  ;;  %266 = vtanh.f32 %v120_v16 }
  0x9d   :  { %v111_v20 = vpop.f32.mrf.mxu0  ;;  %v117_v21 = vpop.f32.mrf.mxu1  ;;  %v153_v22 = vrot.slane %v265_v18, 4  ;;  %268 = vtanh.f32 %v126_v17 }
  0x9e   :  { %270 = vtanh.f32 %v111_v20  ;;  %v142_v23 = vadd.f32 %v263_v15, %v141_v19 }
  0x9f   :  { %272 = vtanh.f32 %v117_v21  ;;  %v154_v24 = vadd.f32 %v265_v18, %v153_v22 }
  0xa0   :  { %v143_v27 = vrot.slane %v142_v23, 2 }
  0xa1   :  { %v155_v32 = vrot.slane %v154_v24, 2 }
  0xa2   :  { %v267_v25 = vpop.eup %266  ;;  %v144_v39 = vadd.f32 %v143_v27, %v142_v23 }
  0xa3   :  { %v269_v26 = vpop.eup %268  ;;  %v165_v28 = vrot.slane %v267_v25, 4  ;;  %v123_v29 = vpop.f32.mrf.mxu2  ;;  %v156_v41 = vadd.f32 %v155_v32, %v154_v24 }
  0xa4   :  { %v129_v30 = vpop.f32.mrf.mxu3  ;;  %v271_v31 = vpop.eup %270  ;;  %v177_v33 = vrot.slane %v269_v26, 4  ;;  %274 = vtanh.f32 %v123_v29  ;;  %v145_v49 = vrot.slane %v144_v39, 1 }
  0xa5   :  { %v273_v34 = vpop.eup %272  ;;  %v166_v35 = vadd.f32 %v267_v25, %v165_v28  ;;  %v147_v36 = vrot.slane %v271_v31, 4  ;;  %276 = vtanh.f32 %v129_v30  ;;  %v157_v52 = vrot.slane %v156_v41, 1 }
  0xa6   :  { %v178_v37 = vadd.f32 %v269_v26, %v177_v33  ;;  %v159_v38 = vrot.slane %v273_v34, 4  ;;  %v146_v61 = vadd.f32 %v145_v49, %v144_v39 }
  0xa7   :  { %v148_v40 = vadd.f32 %v271_v31, %v147_v36  ;;  %v167_v42 = vrot.slane %v166_v35, 2  ;;  %v158_v0 = vadd.f32 %v157_v52, %v156_v41 }
  0xa8   :  { %v160_v43 = vadd.f32 %v273_v34, %v159_v38  ;;  %v179_v46 = vrot.slane %v178_v37, 2 }
  0xa9   :  { %v149_v44 = vrot.slane %v148_v40, 2  ;;  %v168_v53 = vadd.f32 %v167_v42, %v166_v35 }
  0xaa   :  { %v275_v45 = vpop.eup %274  ;;  %v161_v47 = vrot.slane %v160_v43, 2  ;;  %v180_v58 = vadd.f32 %v179_v46, %v178_v37 }
  0xab   :  { %v277_v48 = vpop.eup %276  ;;  %v150_v50 = vadd.f32 %v149_v44, %v148_v40  ;;  %v171_v51 = vrot.slane %v275_v45, 4  ;;  %v169_v1 = vrot.slane %v168_v53, 1 }
  0xac   :  { %v162_v54 = vadd.f32 %v161_v47, %v160_v43  ;;  %v183_v55 = vrot.slane %v277_v48, 4  ;;  %v181_v6 = vrot.slane %v180_v58, 1 }
  0xad   :  { %v151_v56 = vrot.slane %v150_v50, 1  ;;  %v172_v57 = vadd.f32 %v275_v45, %v171_v51  ;;  %v170_v11 = vadd.f32 %v169_v1, %v168_v53 }
  0xae   :  { %v163_v59 = vrot.slane %v162_v54, 1  ;;  %v184_v60 = vadd.f32 %v277_v48, %v183_v55  ;;  %v182_v14 = vadd.f32 %v181_v6, %v180_v58 }
  0xaf   :  { %v152_v62 = vadd.f32 %v151_v56, %v150_v50  ;;  %v173_v63 = vrot.slane %v172_v57, 2 }
  0xb0   :  { %v185_v2 = vrot.slane %v184_v60, 2  ;;  %v164_v4 = vadd.f32 %v163_v59, %v162_v54 }
  0xb1   :  { %v198_v3 = vsel %vm197_vm2, %v152_v62, %v146_v61  ;;  %v174_v5 = vadd.f32 %v173_v63, %v172_v57 }
  0xb2   :  { %v200_v7 = vsel %vm199_vm3, %v158_v0, %v198_v3  ;;  %v186_v8 = vadd.f32 %v185_v2, %v184_v60 }
  0xb3   :  { %v202_v9 = vsel %vm201_vm4, %v164_v4, %v200_v7  ;;  %v175_v10 = vrot.slane %v174_v5, 1 }
  0xb4   :  { %v187_v12 = vrot.slane %v186_v8, 1  ;;  %v204_v15 = vsel %vm203_vm5, %v170_v11, %v202_v9 }
  0xb5   :  { %v176_v13 = vadd.f32 %v175_v10, %v174_v5 }
  0xb6   :  { %v188_v16 = vadd.f32 %v187_v12, %v186_v8 }
  0xb7   :  { %v206_v17 = vsel %vm205_vm6, %v176_v13, %v204_v15 }
  0xb8   :  { %v208_v18 = vsel %vm207_vm7, %v182_v14, %v206_v17 }
  0xb9   :  { %v210_v19 = vsel %vm209_vm8, %v188_v16, %v208_v18 }
  0xba   :  { %213 = vst [vmem:[#allocation7] sm:$0xff] %v210_v19 }
  0xbb   :  { %224 = dma.vmem_to_hbm [thread:$0]  %s220_s1, 128, %s222_s23, [#allocation4]  }
  0xbc   :  { %354 = dma.done.wait [#allocation4], 128  }
  0xbd   :  { %355 = vsyncadd [#allocation4], 4294967168 }
  0xbe   :  { %229 = vsyncpa [#allocation3], 1 }
  0xbf   :  { %230 = vsyncpa [#allocation6], 1 }
  0xc0   :  { %231 = vsyncpa [#allocation4], 1 }

</bundles_post_ra>
